<compile_context>
chip_gen: v5e
topology: v5e:2x2
jax: 0.10.0
libtpu: 0.0.40
codegen_flags: <defaults>
</compile_context>

<pallas_src>
import jax
import jax.numpy as jnp
from jax.experimental import pallas as pl
from jax.experimental.pallas import tpu as pltpu

_LANE = 128            # lane width (last dim)
_BF16_SUBLANE = 16     # bf16 packs 16 rows per vreg (second-to-last dim)
_VMEM_BUDGET = 48 * 1024 * 1024   # conservative resident-footprint target (v7x-safe)


def _round_up(x: int, m: int) -> int:
    return ((x + m - 1) // m) * m


def dqn_mlp_kernel(x_ref,
                   w1_ref, b1_ref,
                   w2_ref, b2_ref,
                   w3_ref, b3_ref,
                   w4_ref, b4_ref,
                   out_ref):
    """Fused 4-layer MLP forward for one batch tile.

    x/weights: bf16 (MXU fast path), biases: f32 (1, N), accumulation: f32.
    """
    x = x_ref[...]                                                        # (TB, S) bf16

    # Layer 1: Linear(state -> hidden) + ReLU   (Dropout == identity, eval)
    h = jnp.dot(x, w1_ref[...], preferred_element_type=jnp.float32) + b1_ref[...]
    h = jnp.maximum(h, 0.0).astype(jnp.bfloat16)

    # Layer 2: Linear(hidden -> hidden) + ReLU  (Dropout == identity, eval)
    h = jnp.dot(h, w2_ref[...], preferred_element_type=jnp.float32) + b2_ref[...]
    h = jnp.maximum(h, 0.0).astype(jnp.bfloat16)

    # Layer 3: Linear(hidden -> hidden//2) + ReLU
    h = jnp.dot(h, w3_ref[...], preferred_element_type=jnp.float32) + b3_ref[...]
    h = jnp.maximum(h, 0.0).astype(jnp.bfloat16)

    # Layer 4: Linear(hidden//2 -> action)  — Q-values, no activation
    q = jnp.dot(h, w4_ref[...], preferred_element_type=jnp.float32) + b4_ref[...]

    out_ref[...] = q.astype(out_ref.dtype)                                # lane-dense slab


def prepare_params(params):
    """Pad + bf16-cast weights ONCE (hoisted out of the per-call forward path).

    Contraction dim of layer 1 (state_dim) is only rounded to the bf16 sublane
    multiple (16), not to 128 — the x block's last dim may equal the full array dim.
    Hidden / output feature dims are rounded to 128 lanes (lane-dense MXU tiles and
    unmasked output stores).  Zero-padding is mathematically inert.
    """
    w1, b1, w2, b2, w3, b3, w4, b4 = params
    state_dim, hidden = w1.shape
    hidden2 = w3.shape[1]
    action_dim = w4.shape[1]

    S = _round_up(state_dim, _BF16_SUBLANE)   # contraction dim: sublane-only padding
    H = _round_up(hidden, _LANE)              # NB: multiples of 256 are ideal on v6e/v7x MXU
    H2 = _round_up(hidden2, _LANE)
    A = _round_up(action_dim, _LANE)

    def pad_w(w, r, c):
        return jnp.pad(w, ((0, r - w.shape[0]), (0, c - w.shape[1]))).astype(jnp.bfloat16)

    def pad_b(b, c):
        return jnp.pad(b, ((0, c - b.shape[0]),)).reshape(1, c).astype(jnp.float32)

    weights = (pad_w(w1, S, H), pad_b(b1, H),
               pad_w(w2, H, H), pad_b(b2, H),
               pad_w(w3, H, H2), pad_b(b3, H2),
               pad_w(w4, H2, A), pad_b(b4, A))
    dims = dict(state_dim=state_dim, hidden=hidden, hidden2=hidden2,
                action_dim=action_dim, S=S, H=H, H2=H2, A=A)
    return weights, dims


def dqn_forward(x, prepared, *, tile_b: int | None = None,
                out_dtype=jnp.float32, core_parallel: bool | None = None):
    """Batched DQN forward.  x: (B, state_dim) f32; `prepared` from prepare_params()."""
    weights, dims = prepared
    S, H, H2, A = dims["S"], dims["H"], dims["H2"], dims["A"]
    B, state_dim = x.shape
    assert state_dim == dims["state_dim"]

    out_bytes = jnp.dtype(out_dtype).itemsize

    # Batch tile: large (grid-step overhead dominated the tiny matmuls), rounded to
    # the bf16 sublane multiple (16 rows / vreg).
    if tile_b is None:
        tile_b = min(2048, _round_up(B, _BF16_SUBLANE))
    tile_b = max(_BF16_SUBLANE, _round_up(tile_b, _BF16_SUBLANE))

    w_bytes = sum(int(w.size) * jnp.dtype(w.dtype).itemsize for w in weights)

    def vmem_need(tb):
        io = 2 * tb * (S * 2 + A * out_bytes)        # double-buffered x/out tiles
        act = tb * (H * 6 + H2 * 6 + A * 4)          # f32 accum + bf16 recast per layer
        return w_bytes + io + act

    # VMEM-residency guard (v7x = 64 MiB physical): shrink tile_b until it fits.
    while tile_b > _BF16_SUBLANE and vmem_need(tile_b) > _VMEM_BUDGET:
        tile_b = max(_BF16_SUBLANE, _round_up(tile_b // 2, _BF16_SUBLANE))
    # TODO(synk): for very large hidden_dim (>~2048 on v7x) switch w2/w3 to a K-tiled
    #             inner pipeline instead of the all-weights-resident design.

    Bp = _round_up(B, tile_b)
    num_tiles = Bp // tile_b

    # Per-call input prep: pad rows to Bp, cols to S (sublane only), cast to bf16.
    xp = jnp.pad(x, ((0, Bp - B), (0, S - state_dim))).astype(jnp.bfloat16)

    # Megacore: only v7x has 2 TensorCores; CORE_PARALLEL genuinely splits the batch
    # axis across them (plain "parallel" does not change codegen).
    if core_parallel is None:
        try:
            core_parallel = "v7" in jax.devices()[0].device_kind.lower()
        except Exception:
            core_parallel = False
    batch_sem = (pltpu.CORE_PARALLEL
                 if (core_parallel and num_tiles >= 2) else pltpu.PARALLEL)

    # Advisory cost estimate (real work, unpadded dims).
    sd, hd, h2d, ad = (dims["state_dim"], dims["hidden"],
                       dims["hidden2"], dims["action_dim"])
    flops = 2 * B * (sd * hd + hd * hd + hd * h2d + h2d * ad)
    bytes_accessed = xp.size * 2 + w_bytes + Bp * A * out_bytes
    cost = pl.CostEstimate(flops=flops, transcendentals=0,
                           bytes_accessed=bytes_accessed)

    vmem_limit = int(min(64 * 1024 * 1024,
                         _round_up(vmem_need(tile_b) + (2 << 20), 1 << 20)))

    def resident(shape):
        # Weight / bias block identical for every batch tile -> stays VMEM-resident.
        return pl.BlockSpec(shape, lambda i: (0, 0))

    out_padded = pl.pallas_call(
        dqn_mlp_kernel,
        out_shape=jax.ShapeDtypeStruct((Bp, A), out_dtype),
        grid=(num_tiles,),
        in_specs=[
            pl.BlockSpec((tile_b, S), lambda i: (i, 0)),   # x: tiled over batch
            resident((S, H)), resident((1, H)),
            resident((H, H)), resident((1, H)),
            resident((H, H2)), resident((1, H2)),
            resident((H2, A)), resident((1, A)),
        ],
        out_specs=pl.BlockSpec((tile_b, A), lambda i: (i, 0)),
        compiler_params=pltpu.CompilerParams(
            dimension_semantics=(batch_sem,),
            vmem_limit_bytes=vmem_limit,
        ),
        cost_estimate=cost,
    )(xp, *weights)

    return out_padded[:B, :dims["action_dim"]]


def init_params(state_dim, action_dim, hidden_dim, key):
    """Deterministic synthetic init (Kaiming-ish uniform, like torch.nn.Linear default)."""
    def linear(k, fan_in, fan_out):
        kw, kb = jax.random.split(k)
        bound = 1.0 / jnp.sqrt(fan_in)
        w = jax.random.uniform(kw, (fan_in, fan_out), jnp.float32, -bound, bound)
        b = jax.random.uniform(kb, (fan_out,), jnp.float32, -bound, bound)
        return w, b

    k1, k2, k3, k4 = jax.random.split(key, 4)
    w1, b1 = linear(k1, state_dim, hidden_dim)
    w2, b2 = linear(k2, hidden_dim, hidden_dim)
    w3, b3 = linear(k3, hidden_dim, hidden_dim // 2)
    w4, b4 = linear(k4, hidden_dim // 2, action_dim)
    return (w1, b1, w2, b2, w3, b3, w4, b4)


def reference_forward_f32(x, params):
    """Pure-JAX f32 reference of DQNNetwork.forward (eval mode)."""
    w1, b1, w2, b2, w3, b3, w4, b4 = params
    h = jnp.maximum(x @ w1 + b1, 0.0)
    h = jnp.maximum(h @ w2 + b2, 0.0)
    h = jnp.maximum(h @ w3 + b3, 0.0)
    return h @ w4 + b4


def reference_forward_bf16(x, params):
    """Reference replicating the kernel's numeric path (bf16 operands, f32 accum)."""
    w1, b1, w2, b2, w3, b3, w4, b4 = params
    bf = jnp.bfloat16
    f32 = jnp.float32
    h = jnp.dot(x.astype(bf), w1.astype(bf), preferred_element_type=f32) + b1
    h = jnp.maximum(h, 0.0).astype(bf)
    h = jnp.dot(h, w2.astype(bf), preferred_element_type=f32) + b2
    h = jnp.maximum(h, 0.0).astype(bf)
    h = jnp.dot(h, w3.astype(bf), preferred_element_type=f32) + b3
    h = jnp.maximum(h, 0.0).astype(bf)
    return jnp.dot(h, w4.astype(bf), preferred_element_type=f32) + b4


if __name__ == "__main__":
    # Small shapes consistent with the module: DQNNetwork(state_dim=32, action_dim=4, hidden_dim=32)
    batch, state_dim, action_dim, hidden_dim = 2, 32, 4, 32

    key = jax.random.PRNGKey(0)
    k_x, k_p = jax.random.split(key)
    x = jax.random.normal(k_x, (batch, state_dim), dtype=jnp.float32)
    params = init_params(state_dim, action_dim, hidden_dim, k_p)

    # Pad / cast weights ONCE (hoisted out of the per-call forward).
    prepared = prepare_params(params)

    q = dqn_forward(x, prepared)
    jax.block_until_ready(q)
    assert q.shape == (batch, action_dim)

    # Exact-path check (same bf16/f32-accum numerics as the kernel; zero padding is inert).
    q_bf16_ref = reference_forward_bf16(x, params)
    assert jnp.allclose(q, q_bf16_ref, atol=2e-4, rtol=2e-4)

    # Semantic check vs the f32 PyTorch-equivalent forward (loose: bf16 weights).
    q_f32_ref = reference_forward_f32(x, params)
    assert jnp.allclose(q, q_f32_ref, atol=1.5e-1, rtol=1.5e-1)

    print("KERNEL_OK")
</pallas_src>

<mosaic_0001>
module attributes {stable_mosaic.version = 11 : i64} {
  func.func @dqn_mlp_kernel(%arg0: i32, %arg1: memref<16x32xbf16, #tpu.memory_space<vmem>>, %arg2: memref<32x128xbf16, #tpu.memory_space<vmem>>, %arg3: memref<1x128xf32, #tpu.memory_space<vmem>>, %arg4: memref<128x128xbf16, #tpu.memory_space<vmem>>, %arg5: memref<1x128xf32, #tpu.memory_space<vmem>>, %arg6: memref<128x128xbf16, #tpu.memory_space<vmem>>, %arg7: memref<1x128xf32, #tpu.memory_space<vmem>>, %arg8: memref<128x128xbf16, #tpu.memory_space<vmem>>, %arg9: memref<1x128xf32, #tpu.memory_space<vmem>>, %arg10: memref<16x128xf32, #tpu.memory_space<vmem>>) attributes {dimension_semantics = [#tpu.dimension_semantics<parallel>], iteration_bounds = array<i64: 1>, scalar_prefetch = 0 : i64, scratch_operands = 0 : i64, tpu.core_type = #tpu.core_type<tc>, window_params = [{transform_indices = @transform_0, window_bounds = array<i64: 16, 32>}, {pipeline_mode = #tpu.pipeline_mode<synchronous>, transform_indices = @transform_1, window_bounds = array<i64: 32, 128>}, {pipeline_mode = #tpu.pipeline_mode<synchronous>, transform_indices = @transform_2, window_bounds = array<i64: 1, 128>}, {pipeline_mode = #tpu.pipeline_mode<synchronous>, transform_indices = @transform_3, window_bounds = array<i64: 128, 128>}, {pipeline_mode = #tpu.pipeline_mode<synchronous>, transform_indices = @transform_4, window_bounds = array<i64: 1, 128>}, {pipeline_mode = #tpu.pipeline_mode<synchronous>, transform_indices = @transform_5, window_bounds = array<i64: 128, 128>}, {pipeline_mode = #tpu.pipeline_mode<synchronous>, transform_indices = @transform_6, window_bounds = array<i64: 1, 128>}, {pipeline_mode = #tpu.pipeline_mode<synchronous>, transform_indices = @transform_7, window_bounds = array<i64: 128, 128>}, {pipeline_mode = #tpu.pipeline_mode<synchronous>, transform_indices = @transform_8, window_bounds = array<i64: 1, 128>}, {transform_indices = @transform_9, window_bounds = array<i64: 16, 128>}]} {
    %c0 = arith.constant 0 : index
    %c0_0 = arith.constant 0 : index
    %0 = vector.load %arg1[%c0, %c0_0] : memref<16x32xbf16, #tpu.memory_space<vmem>>, vector<16x32xbf16>
    %c0_1 = arith.constant 0 : index
    %c0_2 = arith.constant 0 : index
    %1 = vector.load %arg2[%c0_1, %c0_2] : memref<32x128xbf16, #tpu.memory_space<vmem>>, vector<32x128xbf16>
    %cst = arith.constant dense<0.000000e+00> : vector<16x128xf32>
    %2 = tpu.matmul %0, %1, %cst {dimension_numbers = #tpu.dot_dimension_numbers<[1], [0], [0], [1], [0, 0, 1, 1], [], []>} : vector<16x32xbf16>, vector<32x128xbf16>, vector<16x128xf32> -> vector<16x128xf32>
    %c0_3 = arith.constant 0 : index
    %c0_4 = arith.constant 0 : index
    %3 = vector.load %arg3[%c0_3, %c0_4] : memref<1x128xf32, #tpu.memory_space<vmem>>, vector<1x128xf32>
    %4 = vector.broadcast %3 : vector<1x128xf32> to vector<16x128xf32>
    %5 = arith.addf %2, %4 : vector<16x128xf32>
    %cst_5 = arith.constant 0.000000e+00 : f32
    %6 = vector.broadcast %cst_5 : f32 to vector<16x128xf32>
    %7 = arith.maximumf %5, %6 : vector<16x128xf32>
    %8 = arith.truncf %7 : vector<16x128xf32> to vector<16x128xbf16>
    %c0_6 = arith.constant 0 : index
    %c0_7 = arith.constant 0 : index
    %9 = vector.load %arg4[%c0_6, %c0_7] : memref<128x128xbf16, #tpu.memory_space<vmem>>, vector<128x128xbf16>
    %cst_8 = arith.constant dense<0.000000e+00> : vector<16x128xf32>
    %10 = tpu.matmul %8, %9, %cst_8 {dimension_numbers = #tpu.dot_dimension_numbers<[1], [0], [0], [1], [0, 0, 1, 1], [], []>} : vector<16x128xbf16>, vector<128x128xbf16>, vector<16x128xf32> -> vector<16x128xf32>
    %c0_9 = arith.constant 0 : index
    %c0_10 = arith.constant 0 : index
    %11 = vector.load %arg5[%c0_9, %c0_10] : memref<1x128xf32, #tpu.memory_space<vmem>>, vector<1x128xf32>
    %12 = vector.broadcast %11 : vector<1x128xf32> to vector<16x128xf32>
    %13 = arith.addf %10, %12 : vector<16x128xf32>
    %cst_11 = arith.constant 0.000000e+00 : f32
    %14 = vector.broadcast %cst_11 : f32 to vector<16x128xf32>
    %15 = arith.maximumf %13, %14 : vector<16x128xf32>
    %16 = arith.truncf %15 : vector<16x128xf32> to vector<16x128xbf16>
    %c0_12 = arith.constant 0 : index
    %c0_13 = arith.constant 0 : index
    %17 = vector.load %arg6[%c0_12, %c0_13] : memref<128x128xbf16, #tpu.memory_space<vmem>>, vector<128x128xbf16>
    %cst_14 = arith.constant dense<0.000000e+00> : vector<16x128xf32>
    %18 = tpu.matmul %16, %17, %cst_14 {dimension_numbers = #tpu.dot_dimension_numbers<[1], [0], [0], [1], [0, 0, 1, 1], [], []>} : vector<16x128xbf16>, vector<128x128xbf16>, vector<16x128xf32> -> vector<16x128xf32>
    %c0_15 = arith.constant 0 : index
    %c0_16 = arith.constant 0 : index
    %19 = vector.load %arg7[%c0_15, %c0_16] : memref<1x128xf32, #tpu.memory_space<vmem>>, vector<1x128xf32>
    %20 = vector.broadcast %19 : vector<1x128xf32> to vector<16x128xf32>
    %21 = arith.addf %18, %20 : vector<16x128xf32>
    %cst_17 = arith.constant 0.000000e+00 : f32
    %22 = vector.broadcast %cst_17 : f32 to vector<16x128xf32>
    %23 = arith.maximumf %21, %22 : vector<16x128xf32>
    %24 = arith.truncf %23 : vector<16x128xf32> to vector<16x128xbf16>
    %c0_18 = arith.constant 0 : index
    %c0_19 = arith.constant 0 : index
    %25 = vector.load %arg8[%c0_18, %c0_19] : memref<128x128xbf16, #tpu.memory_space<vmem>>, vector<128x128xbf16>
    %cst_20 = arith.constant dense<0.000000e+00> : vector<16x128xf32>
    %26 = tpu.matmul %24, %25, %cst_20 {dimension_numbers = #tpu.dot_dimension_numbers<[1], [0], [0], [1], [0, 0, 1, 1], [], []>} : vector<16x128xbf16>, vector<128x128xbf16>, vector<16x128xf32> -> vector<16x128xf32>
    %c0_21 = arith.constant 0 : index
    %c0_22 = arith.constant 0 : index
    %27 = vector.load %arg9[%c0_21, %c0_22] : memref<1x128xf32, #tpu.memory_space<vmem>>, vector<1x128xf32>
    %28 = vector.broadcast %27 : vector<1x128xf32> to vector<16x128xf32>
    %29 = arith.addf %26, %28 : vector<16x128xf32>
    %c0_23 = arith.constant 0 : index
    %c0_24 = arith.constant 0 : index
    %30 = vector.load %arg10[%c0_23, %c0_24] : memref<16x128xf32, #tpu.memory_space<vmem>>, vector<16x128xf32>
    tpu.vector_store %arg10[%c0_23, %c0_24], %29 {strides = array<i32>} : memref<16x128xf32, #tpu.memory_space<vmem>>, vector<16x128xf32>,
    return
  }
  func.func @transform_0(%arg0: i32) -> (i32, i32) {
    %c0_i32 = arith.constant 0 : i32
    %c0_i32_0 = arith.constant 0 : i32
    return %arg0, %c0_i32 : i32, i32
  }
  func.func @transform_1(%arg0: i32) -> (i32, i32) {
    %c0_i32 = arith.constant 0 : i32
    %c0_i32_0 = arith.constant 0 : i32
    %c0_i32_1 = arith.constant 0 : i32
    return %c0_i32, %c0_i32_0 : i32, i32
  }
  func.func @transform_2(%arg0: i32) -> (i32, i32) {
    %c0_i32 = arith.constant 0 : i32
    %c0_i32_0 = arith.constant 0 : i32
    %c0_i32_1 = arith.constant 0 : i32
    return %c0_i32, %c0_i32_0 : i32, i32
  }
  func.func @transform_3(%arg0: i32) -> (i32, i32) {
    %c0_i32 = arith.constant 0 : i32
    %c0_i32_0 = arith.constant 0 : i32
    %c0_i32_1 = arith.constant 0 : i32
    return %c0_i32, %c0_i32_0 : i32, i32
  }
  func.func @transform_4(%arg0: i32) -> (i32, i32) {
    %c0_i32 = arith.constant 0 : i32
    %c0_i32_0 = arith.constant 0 : i32
    %c0_i32_1 = arith.constant 0 : i32
    return %c0_i32, %c0_i32_0 : i32, i32
  }
  func.func @transform_5(%arg0: i32) -> (i32, i32) {
    %c0_i32 = arith.constant 0 : i32
    %c0_i32_0 = arith.constant 0 : i32
    %c0_i32_1 = arith.constant 0 : i32
    return %c0_i32, %c0_i32_0 : i32, i32
  }
  func.func @transform_6(%arg0: i32) -> (i32, i32) {
    %c0_i32 = arith.constant 0 : i32
    %c0_i32_0 = arith.constant 0 : i32
    %c0_i32_1 = arith.constant 0 : i32
    return %c0_i32, %c0_i32_0 : i32, i32
  }
  func.func @transform_7(%arg0: i32) -> (i32, i32) {
    %c0_i32 = arith.constant 0 : i32
    %c0_i32_0 = arith.constant 0 : i32
    %c0_i32_1 = arith.constant 0 : i32
    return %c0_i32, %c0_i32_0 : i32, i32
  }
  func.func @transform_8(%arg0: i32) -> (i32, i32) {
    %c0_i32 = arith.constant 0 : i32
    %c0_i32_0 = arith.constant 0 : i32
    %c0_i32_1 = arith.constant 0 : i32
    return %c0_i32, %c0_i32_0 : i32, i32
  }
  func.func @transform_9(%arg0: i32) -> (i32, i32) {
    %c0_i32 = arith.constant 0 : i32
    %c0_i32_0 = arith.constant 0 : i32
    return %arg0, %c0_i32 : i32, i32
  }
}

</mosaic_0001>

<bundles_post_ra>
// kernel: tpu_custom_call.1
= control target key start
LH: loop header
LB: loop body
LE: loop exit
PB: predicated region body
PF: predicated region fallthrough
CT: control target
= control target key end

     0   :  { %14 = vsyncpa [#allocation3], 0  ;;  %s827_s0 = inlined_call_operand.hbm [shape: bf16[16,32], index: 0, kind: input, shape index: {}]   ;;  %s828_s1 = inlined_call_operand.hbm [shape: bf16[32,128], index: 1, kind: input, shape index: {}]   ;;  %s829_s2 = inlined_call_operand.vmem [shape: f32[1,128], index: 2, kind: input, shape index: {}]   ;;  %s830_s3 = inlined_call_operand.hbm [shape: bf16[128,128], index: 3, kind: input, shape index: {}]   ;;  %s831_s4 = inlined_call_operand.vmem [shape: f32[1,128], index: 4, kind: input, shape index: {}]   ;;  %s832_s5 = inlined_call_operand.hbm [shape: bf16[128,128], index: 5, kind: input, shape index: {}]   ;;  %s833_s6 = inlined_call_operand.vmem [shape: f32[1,128], index: 6, kind: input, shape index: {}]   ;;  %s834_s7 = inlined_call_operand.hbm [shape: bf16[128,128], index: 7, kind: input, shape index: {}]   ;;  %s835_s8 = inlined_call_operand.vmem [shape: f32[1,128], index: 8, kind: input, shape index: {}]   ;;  %s836_s9 = inlined_call_operand.hbm [shape: f32[16,128], index: 9, kind: output, shape index: {}]  }
   0x1   :  { %15 = vsyncpa [#allocation6], 0 }
   0x2   :  { %16 = vsyncpa [#allocation9], 0 }
   0x3   :  { %17 = vsyncpa [#allocation4], 0  ;;  %s35_s11 = sshll.u32 %s828_s1, 4  ;;  %s737_s12 = smov [#allocation5]   ;;  %s36_s11 = int_to_ptr.hbm [resolvable:$true] %s35_s11 }
   0x4   :  { %s37_s13 = sshll.u32 %s737_s12, 4  ;;  %s65_s16 = sshll.u32 %s832_s5, 4  ;;  %s38_s13 = int_to_ptr.vmem [resolvable:$true] %s37_s13  ;;  %s66_s16 = int_to_ptr.hbm [resolvable:$true] %s65_s16 }
   0x5   :  { %s738_s17 = smov 64   ;;  %s739_s18 = smov 4  }
   0x6   :  { %43 = dma.hbm_to_vmem [thread:$0]  %s36_s11, 256, %s38_s13, [#allocation6], %s738_s17, %s738_s17, %s739_s18  }
   0x7   :  { %s740_s19 = smov [#allocation8]   ;;  %s22_s23 = sshll.u32 %s827_s0, 4  ;;  %s23_s23 = int_to_ptr.hbm [resolvable:$true] %s22_s23 }
   0x8   :  { %s67_s20 = sshll.u32 %s740_s19, 4  ;;  %s50_s25 = sshll.u32 %s830_s3, 4  ;;  %s68_s20 = int_to_ptr.vmem [resolvable:$true] %s67_s20  ;;  %s51_s25 = int_to_ptr.hbm [resolvable:$true] %s50_s25 }
   0x9   :  { %73 = dma.hbm_to_vmem [thread:$0]  %s66_s16, 1024, %s68_s20, [#allocation9], %s738_s17, %s738_s17, %s739_s18  }
   0xa   :  { %s741_s26 = smov [#allocation2]   ;;  %s742_s5 = smov [#allocation7]  }
   0xb   :  { %s24_s27 = sshll.u32 %s741_s26, 4  ;;  %s52_s28 = sshll.u32 %s742_s5, 4  ;;  %s25_s27 = int_to_ptr.vmem [resolvable:$true] %s24_s27  ;;  %s53_s28 = int_to_ptr.vmem [resolvable:$true] %s52_s28 }
   0xc   :  { %30 = dma.hbm_to_vmem [thread:$0]  %s23_s23, 128, %s25_s27, [#allocation3], %s738_s17, %s738_s17, %s739_s18  }
   0xd   :  { %s80_s10 = sshll.u32 %s834_s7, 4  ;;  %s743_s0 = smov [#allocation10]   ;;  %s81_s10 = int_to_ptr.hbm [resolvable:$true] %s80_s10 }
   0xe   :  { %58 = dma.hbm_to_vmem [thread:$0]  %s51_s25, 1024, %s53_s28, [#allocation6], %s738_s17, %s738_s17, %s739_s18  }
   0xf   :  { %s82_s11 = sshll.u32 %s743_s0, 4  ;;  %s83_s11 = int_to_ptr.vmem [resolvable:$true] %s82_s11 }
  0x10   :  { %88 = dma.hbm_to_vmem [thread:$0]  %s81_s10, 1024, %s83_s11, [#allocation9], %s738_s17, %s738_s17, %s739_s18  }
  0x11   :  { %729 = dma.done.wait [#allocation3], 128  }
  0x12   :  { %730 = vsyncadd [#allocation3], 4294967168 }
  0x13   :  { %731 = dma.done.wait [#allocation6], 1280  }
  0x14   :  { %732 = vsyncadd [#allocation6], 4294966016 }
  0x15   :  { %733 = dma.done.wait [#allocation9], 2048  }
  0x16   :  { %734 = vsyncadd [#allocation9], 4294965248  ;;  %v546_v0 = vld [vmem:[#allocation5 + $0x8] sm:$0xff]  ;;  %v545_v2 = vld [vmem:[#allocation5] sm:$0xff]  ;;  %vm139_vm0 = vcmask 261120   ;;  %s744_s16 = smov [#allocation11]  }
  0x17   :  { %v554_v1 = vld [vmem:[#allocation7 + $0x38] sm:$0xff]  ;;  %149 = vmatpush.bf16.msra.mxu0 %v546_v0  ;;  %v553_v3 = vld [vmem:[#allocation7 + $0x30] sm:$0xff]  ;;  %v544_v4 = vld [vmem:[#allocation2] sm:$0xff]  ;;  %s418_s17 = sshll.u32 %s744_s16, 4  ;;  %s745_s20 = smov 128   ;;  %s419_s17 = int_to_ptr.vmem [resolvable:$true] %s418_s17 }
  0x18   :  { %228 = vmatpush.bf16.msra.mxu1 %v554_v1  ;;  %v552_v5 = vld [vmem:[#allocation7 + $0x28] sm:$0xff]  ;;  %v551_v6 = vld [vmem:[#allocation7 + $0x20] sm:$0xff]  ;;  %v550_v7 = vld [vmem:[#allocation7 + $0x18] sm:$0xff]  ;;  %s746_s21 = smov 8  }
  0x19   :  { %v549_v8 = vld [vmem:[#allocation7 + $0x10] sm:$0xff]  ;;  %v548_v9 = vld [vmem:[#allocation7 + $0x8] sm:$0xff]  ;;  %v547_v10 = vld [vmem:[#allocation7] sm:$0xff] }
  0x1a   :  { %v562_v11 = vld [vmem:[#allocation8 + $0x38] sm:$0xff]  ;;  %v561_v12 = vld [vmem:[#allocation8 + $0x30] sm:$0xff]  ;;  %v560_v13 = vld [vmem:[#allocation8 + $0x28] sm:$0xff] }
  0x1b   :  { %150 = vmatpush.bf16.msra.mxu0 %v545_v2  ;;  %313 = vmatpush.bf16.msra.mxu2 %v562_v11  ;;  %v559_v14 = vld [vmem:[#allocation8 + $0x20] sm:$0xff]  ;;  %v581_v16 = vld [vmem:[%s829_s2] ss:$0 sm:$0xff]  ;;  %v558_v23 = vld [vmem:[#allocation8 + $0x18] sm:$0xff] }
  0x1c   :  { %229 = vmatpush.bf16.msra.mxu1 %v553_v3  ;;  %v557_v24 = vld [vmem:[#allocation8 + $0x10] sm:$0xff]  ;;  %v556_v25 = vld [vmem:[#allocation8 + $0x8] sm:$0xff]  ;;  %v555_v26 = vld [vmem:[#allocation8] sm:$0xff] }
  0x1d   :  { %v570_v27 = vld [vmem:[#allocation10 + $0x38] sm:$0xff]  ;;  %v569_v28 = vld [vmem:[#allocation10 + $0x30] sm:$0xff]  ;;  %v568_v29 = vld [vmem:[#allocation10 + $0x28] sm:$0xff] }
  0x1e   :  { %447 = vmatmul.msk.bf16.vlgmr.msra.gmra.mxu0 %vm139_vm0, %v544_v4  ;;  %398 = vmatpush.bf16.msra.mxu3 %v570_v27  ;;  %v567_v30 = vld [vmem:[#allocation10 + $0x20] sm:$0xff]  ;;  %v582_v32 = vld [vmem:[%s831_s4] ss:$0 sm:$0xff]  ;;  %v566_v39 = vld [vmem:[#allocation10 + $0x18] sm:$0xff] }
  0x1f   :  { %314 = vmatpush.bf16.msra.mxu2 %v561_v12  ;;  %v565_v40 = vld [vmem:[#allocation10 + $0x10] sm:$0xff]  ;;  %v564_v41 = vld [vmem:[#allocation10 + $0x8] sm:$0xff]  ;;  %v563_v42 = vld [vmem:[#allocation10] sm:$0xff] }
  0x20   :  { %230 = vmatpush.bf16.msra.mxu1 %v552_v5  ;;  %v583_v44 = vld [vmem:[%s833_s6] ss:$0 sm:$0xff]  ;;  %s420_s6 = sshll.u32 %s836_s9, 4  ;;  %s421_s6 = int_to_ptr.hbm [resolvable:$true] %s420_s6 }
  0x21   :  { %v584_v51 = vld [vmem:[%s835_s8] ss:$0 sm:$0xff] }
  0x22   :  { %399 = vmatpush.bf16.msra.mxu3 %v569_v28 }
  0x23   :  { %315 = vmatpush.bf16.msra.mxu2 %v560_v13 }
  0x24   :  { %231 = vmatpush.bf16.msra.mxu1 %v551_v6 }
  0x26   :  { %400 = vmatpush.bf16.msra.mxu3 %v568_v29 }
  0x27   :  { %316 = vmatpush.bf16.msra.mxu2 %v559_v14 }
  0x28   :  { %232 = vmatpush.bf16.msra.mxu1 %v550_v7 }
  0x2a   :  { %401 = vmatpush.bf16.msra.mxu3 %v567_v30 }
  0x2b   :  { %317 = vmatpush.bf16.msra.mxu2 %v558_v23 }
  0x2c   :  { %233 = vmatpush.bf16.msra.mxu1 %v549_v8 }
  0x2e   :  { %402 = vmatpush.bf16.msra.mxu3 %v566_v39 }
  0x2f   :  { %318 = vmatpush.bf16.msra.mxu2 %v557_v24 }
  0x30   :  { %234 = vmatpush.bf16.msra.mxu1 %v548_v9 }
  0x32   :  { %403 = vmatpush.bf16.msra.mxu3 %v565_v40 }
  0x33   :  { %319 = vmatpush.bf16.msra.mxu2 %v556_v25 }
  0x34   :  { %235 = vmatpush.bf16.msra.mxu1 %v547_v10 }
  0x36   :  { %404 = vmatpush.bf16.msra.mxu3 %v564_v41 }
  0x37   :  { %320 = vmatpush.bf16.msra.mxu2 %v555_v26 }
  0x3a   :  { %405 = vmatpush.bf16.msra.mxu3 %v563_v42 }
  0x9b   :  { %v152_v15 = vpop.f32.mrf.mxu0 }
  0x9c   :  { %v153_v17 = vadd.f32 %v581_v16, %v152_v15 }
  0x9e   :  { %v157_v20 = vmax.f32 %v153_v17, 0.0 }
  0xa3   :  { %v154_v18 = vpop.f32.mrf.mxu0 }
  0xa4   :  { %v155_v19 = vadd.f32 %v581_v16, %v154_v18 }
  0xa6   :  { %v158_v21 = vmax.f32 %v155_v19, 0.0 }
  0xa8   :  { %v159_v22 = vpack.c.bf16 %v158_v21, %v157_v20 }
  0xaa   :  { %236 = vmatmul.bf16.vlgmr.msra.gmra.mxu1 %v159_v22 }
 0x127   :  { %v237_v31 = vpop.f32.mrf.mxu1 }
 0x128   :  { %v238_v33 = vadd.f32 %v582_v32, %v237_v31 }
 0x12a   :  { %v242_v36 = vmax.f32 %v238_v33, 0.0 }
 0x12f   :  { %v239_v34 = vpop.f32.mrf.mxu1 }
 0x130   :  { %v240_v35 = vadd.f32 %v582_v32, %v239_v34 }
 0x132   :  { %v243_v37 = vmax.f32 %v240_v35, 0.0 }
 0x134   :  { %v244_v38 = vpack.c.bf16 %v243_v37, %v242_v36 }
 0x136   :  { %321 = vmatmul.bf16.vlgmr.msra.gmra.mxu2 %v244_v38 }
 0x1b9   :  { %v322_v43 = vpop.f32.mrf.mxu2 }
 0x1ba   :  { %v323_v45 = vadd.f32 %v583_v44, %v322_v43 }
 0x1bc   :  { %v327_v48 = vmax.f32 %v323_v45, 0.0 }
 0x1c1   :  { %v324_v46 = vpop.f32.mrf.mxu2 }
 0x1c2   :  { %v325_v47 = vadd.f32 %v583_v44, %v324_v46 }
 0x1c4   :  { %v328_v49 = vmax.f32 %v325_v47, 0.0 }
 0x1c6   :  { %v329_v50 = vpack.c.bf16 %v328_v49, %v327_v48 }
 0x1c8   :  { %406 = vmatmul.bf16.vlgmr.msra.gmra.mxu3 %v329_v50 }
 0x24b   :  { %v407_v52 = vpop.f32.mrf.mxu3 }
 0x24c   :  { %v408_v53 = vadd.f32 %v584_v51, %v407_v52 }
 0x24e   :  { %412 = vst [vmem:[#allocation11] sm:$0xff] %v408_v53 }
 0x253   :  { %v409_v54 = vpop.f32.mrf.mxu3 }
 0x254   :  { %v410_v55 = vadd.f32 %v584_v51, %v409_v54 }
 0x256   :  { %413 = vst [vmem:[#allocation11 + $0x8] sm:$0xff] %v410_v55 }
 0x257   :  { %426 = dma.vmem_to_hbm [thread:$0]  %s419_s17, 256, %s421_s6, [#allocation4], %s745_s20, %s745_s20, %s746_s21  }
 0x258   :  { %735 = dma.done.wait [#allocation4], 256  }
 0x259   :  { %736 = vsyncadd [#allocation4], 4294967040 }
 0x25a   :  { %431 = vsyncpa [#allocation3], 1 }
 0x25b   :  { %432 = vsyncpa [#allocation6], 1 }
 0x25c   :  { %433 = vsyncpa [#allocation9], 1 }
 0x25d   :  { %434 = vsyncpa [#allocation4], 1 }

</bundles_post_ra>
